<compile_context>
chip_gen: v7x
topology: tpu7x:2x2x1
jax: 0.10.0
libtpu: 0.0.40
codegen_flags: <defaults>
</compile_context>

<pallas_src>
import jax
import jax.numpy as jnp
from jax import lax
from jax.experimental import pallas as pl
from jax.experimental.pallas import tpu as pltpu


def _vmem_budget_bytes() -> int:
    """~75% of physical VMEM (leave headroom for compiler internal scratch)."""
    cap = 64 * 1024 * 1024
    try:
        cap = int(pltpu.get_tpu_info().vmem_capacity_bytes)
    except Exception:
        pass
    return (cap * 3) // 4


def _pick_tile(n: int, target: int, align: int) -> int:
    """Largest divisor of n that is <= target and a multiple of `align`.
    Falls back to the full dimension (always a legal block shape)."""
    if n <= target:
        return n
    for t in range(target, align - 1, -1):
        if n % t == 0 and t % align == 0:
            return t
    return n


# ------------- Pass 1 kernels: y = x @ W_q + b_q,  W_q = W[:Dq, :].T ---------

def _linear_resident_kernel(x_ref, w_ref, b_ref, y_ref):
    # x_ref: (1, t_s, D) f32; w_ref: (D, Dq) bf16 (VMEM-resident); b: (1, Dq) f32.
    x_bf = x_ref[0].astype(jnp.bfloat16)            # in-kernel cast (VPU filler)
    acc = jnp.dot(x_bf, w_ref[...], preferred_element_type=jnp.float32)
    y_ref[0] = (acc + b_ref[...]).astype(y_ref.dtype)


def _linear_ktiled_kernel(x_ref, w_ref, b_ref, y_ref, acc_ref):
    # Fallback when W_q does not fit VMEM: accumulate over K tiles.
    k = pl.program_id(2)

    @pl.when(k == 0)
    def _():
        acc_ref[...] = jnp.zeros_like(acc_ref)

    x_bf = x_ref[0].astype(jnp.bfloat16)
    acc_ref[...] += jnp.dot(x_bf, w_ref[...], preferred_element_type=jnp.float32)

    @pl.when(k == pl.num_programs(2) - 1)
    def _():
        y_ref[0] = (acc_ref[...] + b_ref[...]).astype(y_ref.dtype)


# ------------- Pass 2 kernel: out = q @ q^T (contract last dims) -------------

def _gram_kernel(qr_ref, qc_ref, o_ref):
    # qr: (1, t_q, Dq), qc: (1, S-or-t_q, Dq) -> 'si,ti->st' on the MXU.
    o_ref[0] = lax.dot_general(
        qr_ref[0], qc_ref[0],
        dimension_numbers=(((1,), (1,)), ((), ())),
        preferred_element_type=jnp.float32,
    ).astype(o_ref.dtype)


def model_forward(x, w, bias):
    """x: (B, S, D) f32; w: (D, D) PyTorch Linear weight (out, in); bias: (D,)."""
    B, S, D = x.shape
    assert D % 4 == 0
    Dq = D // 4
    budget = _vmem_budget_bytes()

    # Only the first D//4 Linear outputs survive the two splits -> slice early.
    w_q = jnp.transpose(w[:Dq, :]).astype(jnp.bfloat16)     # (D, Dq)
    b_q = bias[:Dq].reshape(1, Dq).astype(jnp.float32)      # (1, Dq)

    # ---------------- Pass 1: y = x @ W_q + b_q -> (B, S, Dq) bf16 ----------
    w_bytes = D * Dq * 2
    w_resident = w_bytes <= budget // 3        # whole weight stays in VMEM
    t_k = D if w_resident else _pick_tile(D, 1024, 128)

    t_s = _pick_tile(S, 8, 8)                  # safe minimum, refined below
    for tgt in (1024, 512, 256, 128, 64, 32, 16, 8):
        cand = _pick_tile(S, tgt, 8)
        foot = 2 * cand * t_k * 4              # x blocks (f32, double-buffered)
        foot += 2 * cand * Dq * 2              # y blocks (bf16, double-buffered)
        foot += w_bytes if w_resident else (2 * t_k * Dq * 2 + cand * Dq * 4)
        if foot <= budget:
            t_s = cand
            break

    flops_a = 2 * B * S * D * Dq
    if w_resident:
        bytes_a = B * S * D * 4 + w_bytes + Dq * 4 + B * S * Dq * 2
        y = pl.pallas_call(
            _linear_resident_kernel,
            out_shape=jax.ShapeDtypeStruct((B, S, Dq), jnp.bfloat16),
            grid_spec=pltpu.PrefetchScalarGridSpec(
                num_scalar_prefetch=0,
                grid=(B, S // t_s),
                in_specs=[
                    pl.BlockSpec((1, t_s, D), lambda b, i: (b, i, 0)),
                    pl.BlockSpec((D, Dq), lambda b, i: (0, 0)),     # resident W
                    pl.BlockSpec((1, Dq), lambda b, i: (0, 0)),
                ],
                out_specs=pl.BlockSpec((1, t_s, Dq), lambda b, i: (b, i, 0)),
            ),
            compiler_params=pltpu.CompilerParams(
                dimension_semantics=("parallel", "parallel"),
                vmem_limit_bytes=budget,
            ),
            cost_estimate=pl.CostEstimate(
                flops=flops_a, transcendentals=0, bytes_accessed=bytes_a),
        )(x, w_q, b_q)
    else:
        bytes_a = (B * S * D * 4 + B * (S // t_s) * D * Dq * 2
                   + Dq * 4 + B * S * Dq * 2)
        y = pl.pallas_call(
            _linear_ktiled_kernel,
            out_shape=jax.ShapeDtypeStruct((B, S, Dq), jnp.bfloat16),
            grid_spec=pltpu.PrefetchScalarGridSpec(
                num_scalar_prefetch=0,
                grid=(B, S // t_s, D // t_k),
                in_specs=[
                    pl.BlockSpec((1, t_s, t_k), lambda b, i, k: (b, i, k)),
                    pl.BlockSpec((t_k, Dq), lambda b, i, k: (k, 0)),
                    pl.BlockSpec((1, Dq), lambda b, i, k: (0, 0)),
                ],
                out_specs=pl.BlockSpec((1, t_s, Dq), lambda b, i, k: (b, i, 0)),
                scratch_shapes=[pltpu.VMEM((t_s, Dq), jnp.float32)],
            ),
            compiler_params=pltpu.CompilerParams(
                dimension_semantics=("parallel", "parallel", "arbitrary"),
                vmem_limit_bytes=budget,
            ),
            cost_estimate=pl.CostEstimate(
                flops=flops_a, transcendentals=0, bytes_accessed=bytes_a),
        )(x, w_q, b_q)

    # ---------------- Pass 2: out = y @ y^T -> (B, S, S) f32 ----------------
    flops_b = 2 * B * S * S * Dq
    slab_bytes = S * Dq * 2
    qc_resident = slab_bytes <= budget // 3    # whole per-batch y slab in VMEM

    if qc_resident:
        t_q = _pick_tile(S, 8, 8)
        for tgt in (1024, 512, 256, 128, 64, 32, 16, 8):
            cand = _pick_tile(S, tgt, 8)
            foot = 2 * cand * Dq * 2           # qr row blocks (double-buffered)
            foot += slab_bytes                 # resident qc slab
            foot += 2 * cand * S * 4           # lane-dense f32 out blocks
            if foot <= budget:
                t_q = cand
                break
        bytes_b = 2 * B * S * Dq * 2 + B * S * S * 4
        out = pl.pallas_call(
            _gram_kernel,
            out_shape=jax.ShapeDtypeStruct((B, S, S), jnp.float32),
            grid_spec=pltpu.PrefetchScalarGridSpec(
                num_scalar_prefetch=0,
                grid=(B, S // t_q),
                in_specs=[
                    pl.BlockSpec((1, t_q, Dq), lambda b, i: (b, i, 0)),
                    pl.BlockSpec((1, S, Dq), lambda b, i: (b, 0, 0)),  # resident
                ],
                out_specs=pl.BlockSpec((1, t_q, S), lambda b, i: (b, i, 0)),
            ),
            compiler_params=pltpu.CompilerParams(
                dimension_semantics=("parallel", "parallel"),
                vmem_limit_bytes=budget,
            ),
            cost_estimate=pl.CostEstimate(
                flops=flops_b, transcendentals=0, bytes_accessed=bytes_b),
        )(y, y)
    else:
        t_q = _pick_tile(S, 512, 128)
        bytes_b = B * S * Dq * 2 + B * (S // t_q) * S * Dq * 2 + B * S * S * 4
        out = pl.pallas_call(
            _gram_kernel,
            out_shape=jax.ShapeDtypeStruct((B, S, S), jnp.float32),
            grid_spec=pltpu.PrefetchScalarGridSpec(
                num_scalar_prefetch=0,
                grid=(B, S // t_q, S // t_q),
                in_specs=[
                    pl.BlockSpec((1, t_q, Dq), lambda b, i, j: (b, i, 0)),
                    pl.BlockSpec((1, t_q, Dq), lambda b, i, j: (b, j, 0)),
                ],
                out_specs=pl.BlockSpec((1, t_q, t_q), lambda b, i, j: (b, i, j)),
            ),
            compiler_params=pltpu.CompilerParams(
                dimension_semantics=("parallel", "parallel", "parallel"),
                vmem_limit_bytes=budget,
            ),
            cost_estimate=pl.CostEstimate(
                flops=flops_b, transcendentals=0, bytes_accessed=bytes_b),
        )(y, y)

    return out


def reference(x, w, bias):
    """Pure-JAX f32 reference mirroring the PyTorch forward."""
    D = x.shape[-1]
    y = jnp.einsum("bsd,od->bso", x, w) + bias          # nn.Linear: x @ W.T + b
    y = y[..., : D // 2][..., : D // 4]
    return jnp.einsum("bsi,bti->bst", y, y)             # y @ y.transpose(-1,-2)


if __name__ == "__main__":
    # Small demo shapes consistent with the module (dim divisible by 4).
    B, S, DIM = 2, 8, 32

    key = jax.random.PRNGKey(0)
    kx, kw, kb = jax.random.split(key, 3)

    # Deterministic parameter init (PyTorch Linear-style uniform bound).
    bound = 1.0 / (DIM ** 0.5)
    w = jax.random.uniform(kw, (DIM, DIM), jnp.float32, -bound, bound)  # (out, in)
    bias = jax.random.uniform(kb, (DIM,), jnp.float32, -bound, bound)
    x = jax.random.normal(kx, (B, S, DIM), jnp.float32)

    fwd = jax.jit(model_forward)
    out = jax.block_until_ready(fwd(x, w, bias))

    ref = reference(x, w, bias)
    assert out.shape == (B, S, S)
    # bf16 matmuls with f32 accumulation -> loosened tolerance vs. pure-f32 ref.
    # TODO(synk): re-validate tolerance at production dim=6144 (bf16 error
    # compounds through the Gram product); widen y to f32 if accuracy demands.
    assert jnp.allclose(out, ref, atol=5e-2, rtol=5e-2), "mismatch vs reference"

    print("KERNEL_OK")
</pallas_src>

<mosaic_0001>
module attributes {stable_mosaic.version = 11 : i64} {
  func.func @_linear_resident_kernel(%arg0: i32, %arg1: i32, %arg2: memref<1x8x32xf32, #tpu.memory_space<vmem>>, %arg3: memref<32x8xbf16, #tpu.memory_space<vmem>>, %arg4: memref<1x8xf32, #tpu.memory_space<vmem>>, %arg5: memref<1x8x8xbf16, #tpu.memory_space<vmem>>) attributes {dimension_semantics = [#tpu.dimension_semantics<parallel>, #tpu.dimension_semantics<parallel>], iteration_bounds = array<i64: 2, 1>, scalar_prefetch = 0 : i64, scratch_operands = 0 : i64, tpu.core_type = #tpu.core_type<tc>, window_params = [{transform_indices = @transform_0, window_bounds = array<i64: 1, 8, 32>}, {pipeline_mode = #tpu.pipeline_mode<synchronous>, transform_indices = @transform_1, window_bounds = array<i64: 32, 8>}, {pipeline_mode = #tpu.pipeline_mode<synchronous>, transform_indices = @transform_2, window_bounds = array<i64: 1, 8>}, {transform_indices = @transform_3, window_bounds = array<i64: 1, 8, 8>}]} {
    %c0 = arith.constant 0 : index
    %c0_0 = arith.constant 0 : index
    %c0_1 = arith.constant 0 : index
    %0 = vector.load %arg2[%c0, %c0_0, %c0_1] : memref<1x8x32xf32, #tpu.memory_space<vmem>>, vector<1x8x32xf32>
    %1 = vector.shape_cast %0 : vector<1x8x32xf32> to vector<8x32xf32>
    %2 = arith.truncf %1 : vector<8x32xf32> to vector<8x32xbf16>
    %c0_2 = arith.constant 0 : index
    %c0_3 = arith.constant 0 : index
    %3 = vector.load %arg3[%c0_2, %c0_3] : memref<32x8xbf16, #tpu.memory_space<vmem>>, vector<32x8xbf16>
    %cst = arith.constant dense<0.000000e+00> : vector<8x8xf32>
    %4 = tpu.matmul %2, %3, %cst {dimension_numbers = #tpu.dot_dimension_numbers<[1], [0], [0], [1], [0, 0, 1, 1], [], []>} : vector<8x32xbf16>, vector<32x8xbf16>, vector<8x8xf32> -> vector<8x8xf32>
    %c0_4 = arith.constant 0 : index
    %c0_5 = arith.constant 0 : index
    %5 = vector.load %arg4[%c0_4, %c0_5] : memref<1x8xf32, #tpu.memory_space<vmem>>, vector<1x8xf32>
    %6 = vector.broadcast %5 : vector<1x8xf32> to vector<8x8xf32>
    %7 = arith.addf %4, %6 : vector<8x8xf32>
    %8 = arith.truncf %7 : vector<8x8xf32> to vector<8x8xbf16>
    %c0_6 = arith.constant 0 : index
    %c0_7 = arith.constant 0 : index
    %c0_8 = arith.constant 0 : index
    %9 = vector.load %arg5[%c0_6, %c0_7, %c0_8] : memref<1x8x8xbf16, #tpu.memory_space<vmem>>, vector<1x8x8xbf16>
    %10 = vector.shape_cast %9 : vector<1x8x8xbf16> to vector<8x8xbf16>
    %11 = vector.shape_cast %8 : vector<8x8xbf16> to vector<1x8x8xbf16>
    tpu.vector_store %arg5[%c0_6, %c0_7, %c0_8], %11 {strides = array<i32>} : memref<1x8x8xbf16, #tpu.memory_space<vmem>>, vector<1x8x8xbf16>,
    return
  }
  func.func @transform_0(%arg0: i32, %arg1: i32) -> (i32, i32, i32) {
    %c0_i32 = arith.constant 0 : i32
    %c0_i32_0 = arith.constant 0 : i32
    return %arg0, %arg1, %c0_i32 : i32, i32, i32
  }
  func.func @transform_1(%arg0: i32, %arg1: i32) -> (i32, i32) {
    %c0_i32 = arith.constant 0 : i32
    %c0_i32_0 = arith.constant 0 : i32
    %c0_i32_1 = arith.constant 0 : i32
    return %c0_i32, %c0_i32_0 : i32, i32
  }
  func.func @transform_2(%arg0: i32, %arg1: i32) -> (i32, i32) {
    %c0_i32 = arith.constant 0 : i32
    %c0_i32_0 = arith.constant 0 : i32
    %c0_i32_1 = arith.constant 0 : i32
    return %c0_i32, %c0_i32_0 : i32, i32
  }
  func.func @transform_3(%arg0: i32, %arg1: i32) -> (i32, i32, i32) {
    %c0_i32 = arith.constant 0 : i32
    %c0_i32_0 = arith.constant 0 : i32
    return %arg0, %arg1, %c0_i32 : i32, i32, i32
  }
}

module attributes {stable_mosaic.version = 11 : i64} {
  func.func @_gram_kernel(%arg0: i32, %arg1: i32, %arg2: memref<1x8x8xbf16, #tpu.memory_space<vmem>>, %arg3: memref<1x8x8xbf16, #tpu.memory_space<vmem>>, %arg4: memref<1x8x8xf32, #tpu.memory_space<vmem>>) attributes {dimension_semantics = [#tpu.dimension_semantics<parallel>, #tpu.dimension_semantics<parallel>], iteration_bounds = array<i64: 2, 1>, scalar_prefetch = 0 : i64, scratch_operands = 0 : i64, tpu.core_type = #tpu.core_type<tc>, window_params = [{transform_indices = @transform_0, window_bounds = array<i64: 1, 8, 8>}, {transform_indices = @transform_1, window_bounds = array<i64: 1, 8, 8>}, {transform_indices = @transform_2, window_bounds = array<i64: 1, 8, 8>}]} {
    %c0 = arith.constant 0 : index
    %c0_0 = arith.constant 0 : index
    %c0_1 = arith.constant 0 : index
    %0 = vector.load %arg2[%c0, %c0_0, %c0_1] : memref<1x8x8xbf16, #tpu.memory_space<vmem>>, vector<1x8x8xbf16>
    %1 = vector.shape_cast %0 : vector<1x8x8xbf16> to vector<8x8xbf16>
    %c0_2 = arith.constant 0 : index
    %c0_3 = arith.constant 0 : index
    %c0_4 = arith.constant 0 : index
    %2 = vector.load %arg3[%c0_2, %c0_3, %c0_4] : memref<1x8x8xbf16, #tpu.memory_space<vmem>>, vector<1x8x8xbf16>
    %3 = vector.shape_cast %2 : vector<1x8x8xbf16> to vector<8x8xbf16>
    %cst = arith.constant dense<0.000000e+00> : vector<8x8xf32>
    %4 = tpu.matmul %1, %3, %cst {dimension_numbers = #tpu.dot_dimension_numbers<[1], [1], [0], [0], [0, 0, 1, 0], [], []>} : vector<8x8xbf16>, vector<8x8xbf16>, vector<8x8xf32> -> vector<8x8xf32>
    %c0_5 = arith.constant 0 : index
    %c0_6 = arith.constant 0 : index
    %c0_7 = arith.constant 0 : index
    %5 = vector.load %arg4[%c0_5, %c0_6, %c0_7] : memref<1x8x8xf32, #tpu.memory_space<vmem>>, vector<1x8x8xf32>
    %6 = vector.shape_cast %5 : vector<1x8x8xf32> to vector<8x8xf32>
    %7 = vector.shape_cast %4 : vector<8x8xf32> to vector<1x8x8xf32>
    tpu.vector_store %arg4[%c0_5, %c0_6, %c0_7], %7 {strides = array<i32>} : memref<1x8x8xf32, #tpu.memory_space<vmem>>, vector<1x8x8xf32>,
    return
  }
  func.func @transform_0(%arg0: i32, %arg1: i32) -> (i32, i32, i32) {
    %c0_i32 = arith.constant 0 : i32
    %c0_i32_0 = arith.constant 0 : i32
    return %arg0, %arg1, %c0_i32 : i32, i32, i32
  }
  func.func @transform_1(%arg0: i32, %arg1: i32) -> (i32, i32, i32) {
    %c0_i32 = arith.constant 0 : i32
    %c0_i32_0 = arith.constant 0 : i32
    %c0_i32_1 = arith.constant 0 : i32
    return %arg0, %c0_i32, %c0_i32_0 : i32, i32, i32
  }
  func.func @transform_2(%arg0: i32, %arg1: i32) -> (i32, i32, i32) {
    %c0_i32 = arith.constant 0 : i32
    %c0_i32_0 = arith.constant 0 : i32
    return %arg0, %arg1, %c0_i32 : i32, i32, i32
  }
}

</mosaic_0001>

<bundles_post_ra>
// kernel: model_forward.2
= control target key start
LH: loop header
LB: loop body
LE: loop exit
PB: predicated region body
PF: predicated region fallthrough
CT: control target
= control target key end

     0   :  { %s442_s12 = smov 0   ;;  %s444_s13 = smov 0   ;;  %s484_s0 = inlined_call_operand.vmem [shape: f32[2,8,32], index: 0, kind: input, shape index: {}]   ;;  %s485_s1 = inlined_call_operand.vmem [shape: bf16[32,8], index: 1, kind: input, shape index: {}]   ;;  %s486_s2 = inlined_call_operand.vmem [shape: f32[1,8], index: 2, kind: input, shape index: {}]   ;;  %s487_s3 = inlined_call_operand.vmem [shape: bf16[2,8,8], index: 3, kind: output, shape index: {}]  }
   0x1   :  { %s446_s14 = smov 0  }
   0x2 LB: > { %s25_s15 = sadd.s32 1, %s414_s13  ;;  %p348_p0 = scmp.ge.s32.totalorder %s418_s14, 1  ;;  %s418_s14 = sphi %s446_s14, %s13_s14   ;;  %s414_s13 = sphi %s444_s13, %s489_s13   ;;  %s410_s12 = sphi %s442_s12, %s488_s12  }
   0x3   : > { %p27_p1 = scmp.ge.s32.totalorder %s25_s15, 2  ;;  %p155_p2 = scmp.lt.s32.totalorder %s418_s14, 3 }
   0x5   : > { %s491_s15 = smov (%p27_p1, %s25_s15), 0  ;;  %p156_p3 = pnand %p348_p0, %p155_p2 }
   0x6   : > { %v394_v0 = vld [vmem:[%s485_s1] sm:$0xff] (!%p156_p3)   ;;  %v420_v1 = vmov (!%p156_p3), 0.0   ;;  %v395_v2 = vld [vmem:[%s485_s1 + $0x8] sm:$0xff] (!%p156_p3)   ;;  %vm421_vm0 = vmmov (!%p156_p3), 0   ;;  %p183_p4 = scmp.lt.s32.totalorder (!%p156_p3), %s410_s12, 1  ;;  %vm223_vm1 = vcmask (!%p156_p3), 261120  }
   0x7   : > { %159 = sbr.rel (%p156_p3) target bundleno = 237 (0xed), region = 32  ;;  %360 = vmatprep.subr.bf16.mxu0 (!%p156_p3), %v420_v1  ;;  %364 = vmatprep.mubr.msk.bf16.mxu0 (!%p156_p3), %vm421_vm0, %v420_v1  ;;  %v351_v5 = vld [vmem:[%s486_s2] ss:$0 sm:$0xff] (!%p156_p3)  ;;  %vm268_vm2 = vcmask (!%p156_p3), 60416  }
   0x8   : > { %361 = vmatpush3.bf16.msra.mxu0 (!%p156_p3), %v394_v0 }
   0x9   : > { %362 = vmatprep.subr.bf16.mxu0 (!%p156_p3), %v420_v1 }
   0xc   : > { %363 = vmatpush3.bf16.msra.mxu0 (!%p156_p3), %v395_v2 }
   0xe   : > { %s493_s12 = smov (!%p183_p4, %s410_s12), 1 }
   0xf   : > { %s349_s20 = sshll.u32 %s493_s12, 3  ;;  %s350_s26 = sshll.u32 %s493_s12, 2 }
  0x10   : > { %s189_s23 = scalar_lea.vmem %s484_s0, %s349_s20  ;;  %s196_s29 = scalar_lea.vmem %s487_s3, %s350_s26 }
  0x11   : > { %v198_v3 = vld [vmem:[%s189_s23] sm:$0xff] }
  0x12   : > { %v199_v4 = vpack.c.bf16 %v198_v3, %v198_v3 }
  0x14   : > { %365 = vmatmul.mubr.msk.bf16.vlgmr.msra.gmra.mrb[0].mxu0 %vm223_vm1, %v199_v4 }
  0xe7   : > { %v261_v6 = vpop.f32.mrb[0].mxu0 }
  0xe8   : > { %v262_v7 = vadd.f32 %v351_v5, %v261_v6  ;;  %v366_v8 = vpop.f32.mrb[1].mxu0 }
  0xe9   : > { %v264_v9 = vpop.f32.mrb[2].mxu0 }
  0xea   : > { %v267_v10 = vpack.c.bf16 %v262_v7, %v262_v7  ;;  %v367_v11 = vpop.f32.mrb[3].mxu0 }
  0xec   : > { %269 = vst.msk [vmem:[%s196_s29] sm:$0xf] %vm268_vm2, %v267_v10 }
  0xed PF: > { %s13_s14 = sadd.s32 1, %s418_s14   ;;  %s488_s12 = smov %s414_s13 }
  0xee   : > { %p10_p5 = scmp.ge.s32.totalorder %s13_s14, 4   ;;  %s489_s13 = smov %s491_s15 }
  0xf0   :  { %12 = sbr.rel (!%p10_p5) target bundleno = 2 (0x2), region = 62 }

// kernel: model_forward.3
= control target key start
LH: loop header
LB: loop body
LE: loop exit
PB: predicated region body
PF: predicated region fallthrough
CT: control target
= control target key end

     0   :  { %7 = vsyncpa [#allocation3], 0  ;;  %s624_s0 = inlined_call_operand.vmem [shape: bf16[2,8,8], index: 0, kind: input, shape index: {}, may-alias: {0,1}]   ;;  %s625_s1 = inlined_call_operand.vmem [shape: bf16[2,8,8], index: 1, kind: input, shape index: {}, may-alias: {0,1}]   ;;  %s626_s2 = inlined_call_operand.hbm [shape: f32[2,8,8], index: 2, kind: output, shape index: {}]  }
   0x1   :  { %9 = vsyncpa [#allocation3 + $0x1], 0  ;;  %s506_s9 = smov 0   ;;  %s508_s10 = smov 0  }
   0x2   :  { %s510_s11 = smov 0   ;;  %s512_s12 = smov 0  }
   0x3   :  { %s514_s13 = smov 0   ;;  %s516_s14 = smov 0  }
   0x4 LB: > { %s330_s15 = sadd.s32 4294967295, %s486_s14   ;;  %s331_s16 = sadd.s32 4294967294, %s486_s14   ;;  %s486_s14 = sphi %s516_s14, %s15_s14   ;;  %s482_s13 = sphi %s514_s13, %s633_s13   ;;  %s478_s12 = sphi %s512_s12, %s632_s12   ;;  %s474_s11 = sphi %s510_s11, %s631_s11   ;;  %s470_s10 = sphi %s508_s10, %s630_s10   ;;  %s466_s9 = sphi %s506_s9, %s629_s9  }
   0x5   : > { %s27_s17 = sadd.s32 1, %s482_s13  ;;  %s90_s18 = sadd.s32 1, %s474_s11 }
   0x6   : > { %p29_p0 = scmp.ge.s32.totalorder %s27_s17, 2  ;;  %p100_p1 = scmp.ne.s32.totalorder %s474_s11, %s470_s10 }
   0x7   : > { %p101_p2 = scmp.eq.s32.totalorder %s330_s15, 1  ;;  %p106_p3 = scmp.ne.s32.totalorder %s470_s10, %s466_s9 }
   0x8   : > { %s635_s17 = smov (%p29_p0, %s27_s17), 0  ;;  %p107_p5 = scmp.eq.s32.totalorder %s331_s16, 1 }
   0x9   : > { %p546_p4 = por %p101_p2, %p100_p1  ;;  %s85_s20 = ssub.s32 %s482_s13, %s635_s17 }
   0xa   : > { %p334_p6 = scmp.ge.s32.totalorder %s486_s14, 1  ;;  %p88_p7 = scmp.eq.s32.totalorder %s85_s20, 0 }
   0xb   : > { %p553_p8 = por %p107_p5, %p106_p3  ;;  %p142_p9 = scmp.lt.s32.totalorder %s486_s14, 3 }
   0xc   : > { %s559_s22 = scalar_select %p88_p7, %s474_s11, %s90_s18  }
   0xd   : > { %p143_p10 = pnand %p334_p6, %p142_p9 }
   0xe   : > { %p170_p11 = scmp.lt.s32.totalorder (!%p143_p10), %s478_s12, 1  ;;  %v488_v0 = vmov (!%p143_p10), 0.0   ;;  %vm489_vm0 = vmmov (!%p143_p10), 0   ;;  %vm184_vm1 = vcmask (!%p143_p10), 64512   ;;  %s167_s3 = sand.u32 (!%p143_p10), 1, %s470_s10  }
   0xf   : > { %146 = sbr.rel (%p143_p10) target bundleno = 262 (0x106), region = 28  ;;  %345 = vmatprep.subr.bf16.mxu0 (!%p143_p10), %v488_v0  ;;  %347 = vmatprep.mubr.msk.bf16.mxu0 (!%p143_p10), %vm489_vm0, %v488_v0  ;;  %s335_s4 = sshll.u32 (!%p143_p10), %s167_s3, 3 }
  0x10   : > { %s340_s5 = sshll.u32 (!%p143_p10), %s478_s12, 7  ;;  %s169_s6 = scalar_lea.vmem (!%p143_p10), [#allocation2], %s335_s4 }
  0x11   : > { %s247_s7 = sshll.u32 (!%p143_p10), %s169_s6, 4  ;;  %s576_s16 = scalar_lea.hbm (!%p143_p10), %s626_s2, %s340_s5  ;;  %s578_s7 = int_to_ptr.vmem [resolvable:$true] %s247_s7 }
  0x12   : > { %s233_s18 = scalar_lea.sflag (!%p143_p10), [#allocation3], %s167_s3  ;;  %s408_s20 = scalar_lea.vmem (!%p143_p10), %s578_s7, 128 }
  0x13   : > { %p409_p12 = scmp.ne.s32.totalorder (!%p143_p10), %s578_s7, %s408_s20 }
  0x15   : > { %p410_p13 = pnand (!%p143_p10), %p409_p12, %p546_p4 }
  0x16   : > { %s171_s23 = scalar_select %p170_p11, %s478_s12, 1 }
  0x17   : > { %p411_p0 = pneg %p410_p13  ;;  %s490_s12 = smov [#allocation2]  }
  0x18   : > { %s336_s24 = sshll.u32 %s171_s23, 2  ;;  %s412_s23 = sshll.u32 %s490_s12, 4  ;;  %s413_s23 = int_to_ptr.vmem [resolvable:$false] %s412_s23 }
  0x19   : > { %s180_s27 = scalar_lea.vmem %s625_s1, %s336_s24  ;;  %s176_s30 = scalar_lea.vmem %s624_s0, %s336_s24 }
  0x1a   : > { %v183_v1 = vld [vmem:[%s180_s27] sm:$0xf]  ;;  %s414_s24 = scalar_lea.vmem %s413_s23, 256  ;;  %p415_p1 = scmp.lt.s32.totalorder %s578_s7, %s413_s23 }
  0x1b   : > { %v189_v2 = vsel %vm184_vm1, %v183_v1, 0  ;;  %v182_v3 = vld [vmem:[%s176_s30] sm:$0xf]  ;;  %p416_p2 = scmp.lt.s32.totalorder %s414_s24, %s408_s20 }
  0x1c   : > { %346 = vmatpush3.bf16.xpose.msra.mxu0 %v189_v2 }
  0x1d   : > { %p417_p3 = por %p416_p2, %p415_p1 }
  0x1f   : > { %p418_p5 = pnand %p417_p3, %p411_p0 }
  0x23   : > { %348 = vmatmul.mubr.msk.bf16.vlgmr.msra.gmra.mrb[0].mxu0 %vm184_vm1, %v182_v3 }
  0xf6   : > { %v225_v4 = vpop.f32.mrb[0].mxu0 }
  0xf7   : > { %231 = vst.msk [vmem:[%s169_s6] sm:$0xff] %vm184_vm1, %v225_v4  ;;  %v349_v5 = vpop.f32.mrb[1].mxu0 }
  0xf8   : > { %v228_v6 = vpop.f32.mrb[2].mxu0 }
  0xf9   : > { %421 = shalt.err (!%p418_p5)
}
  0xfa   : > { %s422_s25 = scalar_lea.hbm %s576_s16, 128  ;;  %s426_s28 = scalar_lea.hbm %s626_s2, 256 }
  0xfb   : > { %p423_p6 = scmp.ne.s32.totalorder %s576_s16, %s422_s25  ;;  %p427_p10 = scmp.lt.u32.totalorder %s576_s16, %s626_s2 }
  0xfc   : > { %p428_p11 = scmp.lt.u32.totalorder %s426_s28, %s422_s25  ;;  %p430_p13 = scmp.lt.u32.totalorder %s422_s25, %s576_s16 }
  0xfd   : > { %p424_p7 = pnand %p423_p6, %p546_p4 }
  0xfe   : > { %p429_p12 = por %p428_p11, %p427_p10 }
  0xff   : > { %p425_p9 = pneg %p424_p7 }
 0x100   : > { %p431_p0 = por %p430_p13, %p429_p12 }
 0x102   : > { %p432_p1 = pnand %p431_p0, %p425_p9 }
 0x104   : > { %435 = shalt.err (!%p432_p1)
}
 0x105   : > { %351 = dma.vmem_to_hbm [thread:$0]  (%p546_p4), %s578_s7, 128, %s576_s16, %s233_s18   ;;  %v350_v7 = vpop.f32.mrb[3].mxu0 }
 0x106 PF: > { %p357_p2 = scmp.ge.s32.totalorder %s486_s14, 2  ;;  %s259_s3 = sand.u32 1, %s466_s9  }
 0x107   : > { %s260_s4 = scalar_lea.sflag [#allocation3], %s259_s3 }
 0x108   : > { %p354_p3 = pnand %p357_p2, %p553_p8 }
 0x10a   : > { %461 = dma.done.wait (!%p354_p3), %s260_s4, 128  }
 0x10b   : > { %463 = vsyncadd (!%p354_p3), %s260_s4, 4294967168  ;;  %s15_s14 = sadd.s32 1, %s486_s14   ;;  %s629_s9 = smov %s470_s10 }
 0x10c   : > { %p12_p5 = scmp.ge.s32.totalorder %s15_s14, 4   ;;  %s630_s10 = smov %s474_s11 }
 0x10d   : > { %s631_s11 = smov %s559_s22  ;;  %s632_s12 = smov %s482_s13 }
 0x10e   : > { %s633_s13 = smov %s635_s17  ;;  %14 = sbr.rel (!%p12_p5) target bundleno = 4 (0x4), region = 66 }
 0x115   :  { %265 = vsyncpa [#allocation3], 1 }
 0x116   :  { %267 = vsyncpa [#allocation3 + $0x1], 1 }

</bundles_post_ra>
